<compile_context>
chip_gen: v7x
topology: tpu7x:2x2x1
jax: 0.10.0
libtpu: 0.0.40
codegen_flags: <defaults>
</compile_context>

<pallas_src>
import jax
import jax.numpy as jnp
from jax.experimental import pallas as pl
from jax.experimental.pallas import tpu as pltpu


def _make_embed_kernel(tn, n_token_tiles):
    """Builds the patch-embedding kernel for a given token-tile size."""

    def kernel(patches_ref, w_ref, posb_ref, cls_ref, out_ref):
        # patches_ref: (1, TN, K)   w_ref: (K, E)   posb_ref: (TN, E)
        # cls_ref:     (1, E)       out_ref: (1, N+1, E)  (resident across t)
        t = pl.program_id(1)

        # cls-token row (cls + pos[0]); write once per batch element.
        @pl.when(t == 0)
        def _():
            out_ref[0, 0:1, :] = cls_ref[...].astype(out_ref.dtype)

        proj = jnp.dot(patches_ref[0], w_ref[...],
                       preferred_element_type=jnp.float32)          # MXU (TN, E)
        acc = proj + posb_ref[...].astype(jnp.float32)              # bias+pos fused

        if n_token_tiles == 1:
            # Static slice (covers common ViT configs and the test case).
            out_ref[0, 1:1 + tn, :] = acc.astype(out_ref.dtype)
        else:
            out_ref[0, pl.ds(t * tn + 1, tn), :] = acc.astype(out_ref.dtype)

    return kernel


def _pick_token_tile(n, max_tile=512):
    """Largest multiple-of-8 divisor of n that is <= max_tile, else n itself."""
    if n <= max_tile:
        return n
    for t in range(max_tile - max_tile % 8, 7, -8):
        if n % t == 0:
            return t
    return n


def embedding_layer_forward(x, conv_w, conv_b, cls_token, pos_embed):
    """ViT patch-embedding forward.

    x:         (B, C, H, W)
    conv_w:    (E, C, P, P)  Conv2d weight (kernel=stride=P)
    conv_b:    (E,)          Conv2d bias
    cls_token: (1, 1, E)
    pos_embed: (1, N + 1, E)
    returns:   (B, N + 1, E)
    """
    B, C, H, W = x.shape
    E, _, P, _ = conv_w.shape
    Hp, Wp = H // P, W // P
    N = Hp * Wp
    K = C * P * P

    # im2col: non-overlapping PxP patches, flattened in (c, i, j) order to
    # match the Conv2d weight layout (E, C, P, P).  Pure layout, no compute.
    patches = (x.reshape(B, C, Hp, P, Wp, P)
                 .transpose(0, 2, 4, 1, 3, 5)
                 .reshape(B, N, K))
    w_mat = conv_w.reshape(E, K).T.astype(x.dtype)             # (K, E)

    # Fold conv bias into the patch-token positional rows (tiny (N, E) add in
    # the wrapper), and fold pos_embed[:, 0] into the cls row.
    posb = (pos_embed[0, 1:, :].astype(jnp.float32)
            + conv_b.astype(jnp.float32)[None, :]).astype(x.dtype)          # (N, E)
    cls_row = (cls_token[0].astype(jnp.float32)
               + pos_embed[0, :1, :].astype(jnp.float32)).astype(x.dtype)   # (1, E)

    TN = _pick_token_tile(N)
    n_tiles = N // TN
    grid = (B, n_tiles)

    return pl.pallas_call(
        _make_embed_kernel(TN, n_tiles),
        out_shape=jax.ShapeDtypeStruct((B, N + 1, E), x.dtype),
        grid=grid,
        in_specs=[
            pl.BlockSpec((1, TN, K), lambda b, t: (b, t, 0)),   # patches
            pl.BlockSpec((K, E), lambda b, t: (0, 0)),          # projection W (resident)
            pl.BlockSpec((TN, E), lambda b, t: (t, 0)),         # pos+bias rows
            pl.BlockSpec((1, E), lambda b, t: (0, 0)),          # cls row (resident)
        ],
        out_specs=pl.BlockSpec((1, N + 1, E), lambda b, t: (b, 0, 0)),
        compiler_params=pltpu.CompilerParams(
            dimension_semantics=("parallel", "arbitrary")),
    )(patches, w_mat, posb, cls_row)


def _reference(x, conv_w, conv_b, cls_token, pos_embed):
    # Pure-JAX reference mirroring the PyTorch module.
    B = x.shape[0]
    E, _, P, _ = conv_w.shape
    emb = jax.lax.conv_general_dilated(
        x.astype(jnp.float32), conv_w.astype(jnp.float32),
        window_strides=(P, P), padding="VALID",
        dimension_numbers=("NCHW", "OIHW", "NCHW"))
    emb = emb + conv_b.astype(jnp.float32)[None, :, None, None]
    z = emb.reshape(B, E, -1).transpose(0, 2, 1)                 # (B, N, E)
    cls = jnp.broadcast_to(cls_token.astype(jnp.float32), (B, 1, E))
    z = jnp.concatenate([cls, z], axis=1)
    return z + pos_embed.astype(jnp.float32)


if __name__ == "__main__":
    key = jax.random.PRNGKey(0)
    k1, k2, k3, k4, k5 = jax.random.split(key, 5)

    # Small shapes consistent with the module: img 16x16, patch 4 -> 16 patches.
    B, C, H, W = 2, 3, 16, 16
    P, E = 4, 32
    T = (H // P) * (W // P) + 1   # 17 tokens incl. cls

    x = jax.random.normal(k1, (B, C, H, W), dtype=jnp.float32)
    conv_w = jax.random.normal(k2, (E, C, P, P), dtype=jnp.float32) * 0.02
    conv_b = jax.random.normal(k3, (E,), dtype=jnp.float32) * 0.02
    cls_token = jax.random.normal(k4, (1, 1, E), dtype=jnp.float32) * 1e-6
    pos_embed = jax.random.normal(k5, (1, T, E), dtype=jnp.float32) * 0.02

    fwd = jax.jit(embedding_layer_forward)
    out = jax.block_until_ready(fwd(x, conv_w, conv_b, cls_token, pos_embed))

    ref = _reference(x, conv_w, conv_b, cls_token, pos_embed)
    assert out.shape == (B, T, E), out.shape
    max_err = float(jnp.max(jnp.abs(out.astype(jnp.float32) - ref)))
    assert jnp.allclose(out.astype(jnp.float32), ref, atol=5e-3, rtol=5e-3), max_err

    print("KERNEL_OK")
</pallas_src>

<mosaic_0001>
module attributes {stable_mosaic.version = 11 : i64} {
  func.func @kernel(%arg0: i32, %arg1: i32, %arg2: memref<1x16x48xf32, #tpu.memory_space<vmem>>, %arg3: memref<48x32xf32, #tpu.memory_space<vmem>>, %arg4: memref<16x32xf32, #tpu.memory_space<vmem>>, %arg5: memref<1x32xf32, #tpu.memory_space<vmem>>, %arg6: memref<1x17x32xf32, #tpu.memory_space<vmem>>) attributes {dimension_semantics = [#tpu.dimension_semantics<parallel>, #tpu.dimension_semantics<arbitrary>], iteration_bounds = array<i64: 2, 1>, scalar_prefetch = 0 : i64, scratch_operands = 0 : i64, tpu.core_type = #tpu.core_type<tc>, window_params = [{transform_indices = @transform_0, window_bounds = array<i64: 1, 16, 48>}, {pipeline_mode = #tpu.pipeline_mode<synchronous>, transform_indices = @transform_1, window_bounds = array<i64: 48, 32>}, {transform_indices = @transform_2, window_bounds = array<i64: 16, 32>}, {pipeline_mode = #tpu.pipeline_mode<synchronous>, transform_indices = @transform_3, window_bounds = array<i64: 1, 32>}, {transform_indices = @transform_4, window_bounds = array<i64: 1, 17, 32>}]} {
    %c0_i32 = arith.constant 0 : i32
    %0 = arith.cmpi eq, %arg1, %c0_i32 : i32
    %1 = arith.extui %0 : i1 to i32
    %c0_i32_0 = arith.constant 0 : i32
    %2 = arith.cmpi ne, %1, %c0_i32_0 : i32
    scf.if %2 {
      %c0_9 = arith.constant 0 : index
      %c0_10 = arith.constant 0 : index
      %12 = vector.load %arg5[%c0_9, %c0_10] : memref<1x32xf32, #tpu.memory_space<vmem>>, vector<1x32xf32>
      %c0_11 = arith.constant 0 : index
      %c0_12 = arith.constant 0 : index
      %c0_13 = arith.constant 0 : index
      %13 = vector.load %arg6[%c0_11, %c0_12, %c0_13] : memref<1x17x32xf32, #tpu.memory_space<vmem>>, vector<1x1x32xf32>
      %14 = vector.shape_cast %13 : vector<1x1x32xf32> to vector<1x32xf32>
      %15 = vector.shape_cast %12 : vector<1x32xf32> to vector<1x1x32xf32>
      tpu.vector_store %arg6[%c0_11, %c0_12, %c0_13], %15 {strides = array<i32>} : memref<1x17x32xf32, #tpu.memory_space<vmem>>, vector<1x1x32xf32>,
    } else {
    }
    %c0 = arith.constant 0 : index
    %c0_1 = arith.constant 0 : index
    %c0_2 = arith.constant 0 : index
    %3 = vector.load %arg2[%c0, %c0_1, %c0_2] : memref<1x16x48xf32, #tpu.memory_space<vmem>>, vector<1x16x48xf32>
    %4 = vector.shape_cast %3 : vector<1x16x48xf32> to vector<16x48xf32>
    %c0_3 = arith.constant 0 : index
    %c0_4 = arith.constant 0 : index
    %5 = vector.load %arg3[%c0_3, %c0_4] : memref<48x32xf32, #tpu.memory_space<vmem>>, vector<48x32xf32>
    %cst = arith.constant dense<0.000000e+00> : vector<16x32xf32>
    %6 = tpu.matmul %4, %5, %cst {dimension_numbers = #tpu.dot_dimension_numbers<[1], [0], [0], [1], [0, 0, 1, 1], [], []>} : vector<16x48xf32>, vector<48x32xf32>, vector<16x32xf32> -> vector<16x32xf32>
    %c0_5 = arith.constant 0 : index
    %c0_6 = arith.constant 0 : index
    %7 = vector.load %arg4[%c0_5, %c0_6] : memref<16x32xf32, #tpu.memory_space<vmem>>, vector<16x32xf32>
    %8 = arith.addf %6, %7 : vector<16x32xf32>
    %c0_7 = arith.constant 0 : index
    %c1 = arith.constant 1 : index
    %c0_8 = arith.constant 0 : index
    %9 = vector.load %arg6[%c0_7, %c1, %c0_8] : memref<1x17x32xf32, #tpu.memory_space<vmem>>, vector<1x16x32xf32>
    %10 = vector.shape_cast %9 : vector<1x16x32xf32> to vector<16x32xf32>
    %11 = vector.shape_cast %8 : vector<16x32xf32> to vector<1x16x32xf32>
    tpu.vector_store %arg6[%c0_7, %c1, %c0_8], %11 {strides = array<i32>} : memref<1x17x32xf32, #tpu.memory_space<vmem>>, vector<1x16x32xf32>,
    return
  }
  func.func @transform_0(%arg0: i32, %arg1: i32) -> (i32, i32, i32) {
    %c0_i32 = arith.constant 0 : i32
    %c0_i32_0 = arith.constant 0 : i32
    return %arg0, %arg1, %c0_i32 : i32, i32, i32
  }
  func.func @transform_1(%arg0: i32, %arg1: i32) -> (i32, i32) {
    %c0_i32 = arith.constant 0 : i32
    %c0_i32_0 = arith.constant 0 : i32
    %c0_i32_1 = arith.constant 0 : i32
    return %c0_i32, %c0_i32_0 : i32, i32
  }
  func.func @transform_2(%arg0: i32, %arg1: i32) -> (i32, i32) {
    %c0_i32 = arith.constant 0 : i32
    %c0_i32_0 = arith.constant 0 : i32
    return %arg1, %c0_i32 : i32, i32
  }
  func.func @transform_3(%arg0: i32, %arg1: i32) -> (i32, i32) {
    %c0_i32 = arith.constant 0 : i32
    %c0_i32_0 = arith.constant 0 : i32
    %c0_i32_1 = arith.constant 0 : i32
    return %c0_i32, %c0_i32_0 : i32, i32
  }
  func.func @transform_4(%arg0: i32, %arg1: i32) -> (i32, i32, i32) {
    %c0_i32 = arith.constant 0 : i32
    %c0_i32_0 = arith.constant 0 : i32
    %c0_i32_1 = arith.constant 0 : i32
    return %arg0, %c0_i32, %c0_i32_0 : i32, i32, i32
  }
}

</mosaic_0001>

<bundles_post_ra>
// kernel: embedding_layer_forward.1
= control target key start
LH: loop header
LB: loop body
LE: loop exit
PB: predicated region body
PF: predicated region fallthrough
CT: control target
= control target key end

     0   :  { %s558_s15 = smov 0   ;;  %s560_s16 = smov 0   ;;  %s618_s0 = inlined_call_operand.vmem [shape: f32[2,16,48], index: 0, kind: input, shape index: {}]   ;;  %s619_s1 = inlined_call_operand.vmem [shape: f32[48,32], index: 1, kind: input, shape index: {}]   ;;  %s620_s2 = inlined_call_operand.vmem [shape: f32[16,32], index: 2, kind: input, shape index: {}]   ;;  %s621_s3 = inlined_call_operand.vmem [shape: f32[1,32], index: 3, kind: input, shape index: {}]   ;;  %s622_s4 = inlined_call_operand.vmem [shape: f32[2,17,32], index: 4, kind: output, shape index: {}]  }
   0x1   :  { %s562_s17 = smov 0  }
   0x2 LB: > { %s26_s18 = sadd.s32 1, %s527_s16  ;;  %p440_p0 = scmp.ge.s32.totalorder %s531_s17, 1  ;;  %s531_s17 = sphi %s562_s17, %s14_s17   ;;  %s527_s16 = sphi %s560_s16, %s624_s16   ;;  %s523_s15 = sphi %s558_s15, %s623_s15  }
   0x3   : > { %p28_p1 = scmp.ge.s32.totalorder %s26_s18, 2  ;;  %p192_p2 = scmp.lt.s32.totalorder %s531_s17, 3 }
   0x5   : > { %s626_s18 = smov (%p28_p1, %s26_s18), 0  ;;  %p193_p3 = pnand %p440_p0, %p192_p2 }
   0x6   : > { %v257_v0 = vld [vmem:[%s619_s1] sm:$0xff] (!%p193_p3)  ;;  %v258_v1 = vld [vmem:[%s619_s1 + $0x8] sm:$0xff] (!%p193_p3)  ;;  %v259_v2 = vld [vmem:[%s619_s1 + $0x10] sm:$0xff] (!%p193_p3)  ;;  %p228_p4 = scmp.lt.s32.totalorder (!%p193_p3), %s523_s15, 1  ;;  %vm253_vm0 = vcmask (!%p193_p3), 253952   ;;  %vm265_vm1 = vcmask (!%p193_p3), 392192  }
   0x7   : > { %196 = sbr.rel (%p193_p3) target bundleno = 237 (0xed), region = 36  ;;  %v472_v3 = vpack.c.bf16 (!%p193_p3), %v258_v1, %v257_v0  ;;  %v260_v4 = vld [vmem:[%s619_s1 + $0x18] sm:$0xff] (!%p193_p3)  ;;  %v261_v6 = vld [vmem:[%s619_s1 + $0x20] sm:$0xff] (!%p193_p3)  ;;  %v262_v7 = vld [vmem:[%s619_s1 + $0x28] sm:$0xff] (!%p193_p3)  ;;  %vm347_vm2 = vcmask (!%p193_p3), 261120  }
   0x8   : > { %v476_v5 = vpack.c.bf16 (!%p193_p3), %v260_v4, %v259_v2  ;;  %v252_v8 = vld [vmem:[%s621_s3] sm:$0x1] (!%p193_p3)  ;;  %v480_v9 = vpack.c.bf16 (!%p193_p3), %v262_v7, %v261_v6  ;;  %v264_v12 = vld [vmem:[%s620_s2 + $0x8] sm:$0xff] (!%p193_p3) }
   0x9   : > { %473 = vmatprep.subr.bf16.mxu0 (!%p193_p3), %v472_v3  ;;  %v263_v13 = vld [vmem:[%s620_s2] sm:$0xff] (!%p193_p3) }
   0xa   : > { %475 = vmatpush3.bf16.msra.mxu0 (!%p193_p3), %v472_v3 }
   0xb   : > { %477 = vmatprep.subr.bf16.mxu0 (!%p193_p3), %v476_v5 }
   0xe   : > { %s628_s15 = smov (!%p228_p4, %s523_s15), 1  ;;  %479 = vmatpush3.bf16.msra.mxu0 %v476_v5 }
   0xf   : > { %s448_s5 = sshll.u32 %s628_s15, 4  ;;  %s484_s6 = smul.u32 24, %s628_s15  ;;  %481 = vmatprep.subr.bf16.mxu0 %v480_v9 }
  0x10   : > { %s235_s11 = scalar_lea.vmem %s618_s0, %s448_s5 }
  0x11   : > { %s247_s14 = scalar_lea.vmem %s622_s4, %s484_s6  ;;  %v255_v10 = vld [vmem:[%s235_s11] sm:$0xff]  ;;  %v256_v11 = vld [vmem:[%s235_s11 + $0x8] sm:$0xff] }
  0x12   : > { %254 = vst.msk [vmem:[%s247_s14] sm:$0x1] %vm253_vm0, %v252_v8  ;;  %469 = vmatprep.mubr.msk.f32.mxu0 %vm265_vm1, %v255_v10  ;;  %483 = vmatpush3.bf16.msra.mxu0 %v480_v9 }
  0x15   : > { %470 = vmatmul.mubr.msk.f32.vlgmr.msra.gmra.mrb[0].mxu0 %vm265_vm1, %v256_v11 }
  0xe8   : > { %v471_v14 = vpop.f32.mrb[0].mxu0 }
  0xe9   : > { %v344_v15 = vadd.f32 %v471_v14, %v264_v12  ;;  %v338_v16 = vpop.f32.mrb[1].mxu0 }
  0xea   : > { %v339_v17 = vadd.f32 %v338_v16, %v263_v13 }
  0xeb   : > { %349 = vst.msk [vmem:[%s247_s14 + $0x9] sm:$0xff] %vm347_vm2, %v344_v15 }
  0xec   : > { %348 = vst.msk [vmem:[%s247_s14 + $0x1] sm:$0xff] %vm347_vm2, %v339_v17 }
  0xed PF: > { %s14_s17 = sadd.s32 1, %s531_s17   ;;  %s623_s15 = smov %s527_s16 }
  0xee   : > { %p11_p5 = scmp.ge.s32.totalorder %s14_s17, 4   ;;  %s624_s16 = smov %s626_s18 }
  0xf0   :  { %13 = sbr.rel (!%p11_p5) target bundleno = 2 (0x2), region = 73 }

</bundles_post_ra>
